<compile_context>
chip_gen: v7x
topology: tpu7x:2x2x1
jax: 0.10.0
libtpu: 0.0.40
codegen_flags: <defaults>
</compile_context>

<pallas_src>
import functools

import jax
import jax.numpy as jnp
from jax.experimental import pallas as pl
from jax.experimental.pallas import tpu as pltpu


def _round_up(a, m):
    return (a + m - 1) // m * m


def _pick_rows_tile(n_rows, target=1024):
    """Rows per output tile: multiple of 8, ideally dividing n_rows exactly."""
    if n_rows <= target:
        return _round_up(n_rows, 8)
    tgt = max(8, target - (target % 8))
    for cand in range(tgt, max(8, tgt // 2) - 1, -8):
        if n_rows % cand == 0:
            return cand
    return tgt  # cdiv grid + zero-padded tail handles the remainder


def _conv_quant_kernel(qp_ref, x_ref, w_ref, b_ref, o_ref, *,
                       rows_tile, k_row_step, winlen):
    """One output row-tile: winlen shifted matmuls + bias + tanh + dequant."""
    i = pl.program_id(0)
    base = pl.multiple_of(i * rows_tile, 8)      # rows_tile is a multiple of 8
    cout = o_ref.shape[-1]

    acc = jnp.zeros((rows_tile, cout), jnp.float32)
    for k in range(winlen):                      # static, unrolled (winlen small)
        xk = x_ref[pl.ds(base + k * k_row_step, rows_tile), :]
        acc = acc + jnp.dot(xk, w_ref[k], preferred_element_type=jnp.float32)

    z = acc + b_ref[...]                         # (rows_tile, Cout) + (1, Cout)
    scale = qp_ref[0:1, 0:1]                     # (1, 1) broadcasts
    zp = qp_ref[0:1, 1:2]
    o_ref[...] = ((jnp.tanh(z) - zp) * scale).astype(o_ref.dtype)


def convolution_quant_forward(x, weight, bias=None, stride=1, pad=None,
                              rows_per_tile=1024):
    """Pallas implementation of taiyaki Convolution_Quant.forward.

    x: (T, B, insize) float; weight: (size, insize, winlen) (PyTorch Conv1d
    layout); bias: (size,) or None.  Returns (T_out, B, size).
    """
    t_in, b, cin = x.shape
    cout, cin_w, winlen = weight.shape
    assert cin_w == cin, (cin_w, cin)

    if pad is None:
        pad = (winlen // 2, (winlen - 1) // 2)
    pad0, pad1 = pad

    xf = x.astype(jnp.float32)

    # 4-bit quantisation parameters of the input (quantize_tensor / num_bits=4);
    # used to dequantise the activation output exactly like the torch forward.
    mn = jnp.min(xf)
    mx = jnp.max(xf)
    scale = (mx - mn) / 15.0
    zero_point = jnp.clip(-mn / scale, 0.0, 15.0)
    qparams = jnp.stack([scale, zero_point]).reshape(1, 2).astype(jnp.float32)

    # nn.ConstantPad1d on the time dimension.
    xp = jnp.pad(xf, ((pad0, pad1), (0, 0), (0, 0)))
    t_pad = t_in + pad0 + pad1
    t_out = (t_pad - winlen) // stride + 1
    n_out = t_out * b

    rows_tile = _pick_rows_tile(n_out, rows_per_tile)
    n_pad_rows = _round_up(n_out, rows_tile)
    grid = (n_pad_rows // rows_tile,)

    if stride == 1:
        # (T_pad, B, Cin) -> (T_pad*B, Cin) is free (row-major, time-major /
        # batch-minor), so conv shift k == +k*B rows.  Pad so the last tile's
        # haloed reads stay in range; the padded tail rows are discarded.
        xr = xp.reshape(t_pad * b, cin)
        k_row_step = b
        need_rows = n_pad_rows + (winlen - 1) * b
        if xr.shape[0] < need_rows:
            xr = jnp.pad(xr, ((0, need_rows - xr.shape[0]), (0, 0)))
    else:
        # TODO(synk): stride > 1 builds a winlen-wide strided row view
        # (im2col-lite) in the wrapper, reading x `winlen` times from HBM.
        slabs = []
        for k in range(winlen):
            sl = xp[k:k + (t_out - 1) * stride + 1:stride].reshape(n_out, cin)
            if n_pad_rows > n_out:
                sl = jnp.pad(sl, ((0, n_pad_rows - n_out), (0, 0)))
            slabs.append(sl)
        xr = jnp.concatenate(slabs, axis=0)
        k_row_step = n_pad_rows

    # (size, insize, winlen) -> (winlen, insize, size) so w_ref[k] is (Cin, Cout).
    wk = jnp.transpose(weight, (2, 1, 0)).astype(jnp.float32)
    if bias is None:
        bias = jnp.zeros((cout,), jnp.float32)
    b2 = bias.astype(jnp.float32).reshape(1, cout)

    kernel = functools.partial(_conv_quant_kernel, rows_tile=rows_tile,
                               k_row_step=k_row_step, winlen=winlen)

    out_flat = pl.pallas_call(
        kernel,
        out_shape=jax.ShapeDtypeStruct((n_pad_rows, cout), x.dtype),
        grid_spec=pltpu.PrefetchScalarGridSpec(
            num_scalar_prefetch=0,
            grid=grid,
            in_specs=[
                pl.BlockSpec((1, 2), lambda i: (0, 0)),                 # quant params
                pl.BlockSpec((xr.shape[0], cin), lambda i: (0, 0)),     # x rows (resident)
                pl.BlockSpec((winlen, cin, cout), lambda i: (0, 0, 0)),  # weights
                pl.BlockSpec((1, cout), lambda i: (0, 0)),               # bias
            ],
            out_specs=pl.BlockSpec((rows_tile, cout), lambda i: (i, 0)),
        ),
        compiler_params=pltpu.CompilerParams(
            dimension_semantics=("parallel",),
            vmem_limit_bytes=32 * 1024 * 1024,
        ),
    )(qparams, xr, wk, b2)

    return out_flat[:n_out].reshape(t_out, b, cout).astype(x.dtype)


def _reference(x, weight, bias, stride=1, pad=None):
    """Pure-JAX reference for Convolution_Quant.forward."""
    cout, cin, winlen = weight.shape
    if pad is None:
        pad = (winlen // 2, (winlen - 1) // 2)
    xf = x.astype(jnp.float32)
    mn, mx = jnp.min(xf), jnp.max(xf)
    scale = (mx - mn) / 15.0
    zp = jnp.clip(-mn / scale, 0.0, 15.0)
    xp = jnp.pad(xf, ((pad[0], pad[1]), (0, 0), (0, 0)))
    t_out = (xp.shape[0] - winlen) // stride + 1
    acc = jnp.zeros((t_out, x.shape[1], cout), jnp.float32)
    for k in range(winlen):
        xk = xp[k:k + (t_out - 1) * stride + 1:stride]          # (t_out, B, Cin)
        acc = acc + jnp.einsum('tbc,oc->tbo', xk,
                               weight[:, :, k].astype(jnp.float32))
    z = acc + bias.astype(jnp.float32)[None, None, :]
    return (scale * (jnp.tanh(z) - zp)).astype(x.dtype)


if __name__ == "__main__":
    key = jax.random.PRNGKey(0)
    kx, kw, kb = jax.random.split(key, 3)

    # Small shapes consistent with the module: time=96, batch=8,
    # insize=16, size=64, winlen=5, stride=1, default "same-ish" padding.
    T, B, INSIZE, SIZE, WINLEN, STRIDE = 96, 8, 16, 64, 5, 1
    x = jax.random.normal(kx, (T, B, INSIZE), dtype=jnp.float32)
    weight = 0.2 * jax.random.normal(kw, (SIZE, INSIZE, WINLEN), dtype=jnp.float32)
    bias = 0.5 * jax.random.normal(kb, (SIZE,), dtype=jnp.float32)

    # rows_per_tile=256 -> 3 output row tiles (exercises the tiled grid).
    out = convolution_quant_forward(x, weight, bias, stride=STRIDE,
                                    rows_per_tile=256)
    out = jax.block_until_ready(out)

    ref = _reference(x, weight, bias, stride=STRIDE)
    assert out.shape == ref.shape == (T, B, SIZE), (out.shape, ref.shape)
    assert out.dtype == x.dtype
    err = float(jnp.max(jnp.abs(out - ref)))
    assert jnp.allclose(out, ref, atol=2e-2, rtol=2e-2), f"max abs err {err}"
    print("KERNEL_OK")
</pallas_src>

<mosaic_0001>
module attributes {stable_mosaic.version = 11 : i64} {
  func.func @_conv_quant_kernel(%arg0: i32, %arg1: memref<1x2xf32, #tpu.memory_space<vmem>>, %arg2: memref<800x16xf32, #tpu.memory_space<vmem>>, %arg3: memref<5x16x64xf32, #tpu.memory_space<vmem>>, %arg4: memref<1x64xf32, #tpu.memory_space<vmem>>, %arg5: memref<256x64xf32, #tpu.memory_space<vmem>>) attributes {dimension_semantics = [#tpu.dimension_semantics<parallel>], iteration_bounds = array<i64: 3>, scalar_prefetch = 0 : i64, scratch_operands = 0 : i64, tpu.core_type = #tpu.core_type<tc>, window_params = [{pipeline_mode = #tpu.pipeline_mode<synchronous>, transform_indices = @transform_0, window_bounds = array<i64: 1, 2>}, {pipeline_mode = #tpu.pipeline_mode<synchronous>, transform_indices = @transform_1, window_bounds = array<i64: 800, 16>}, {pipeline_mode = #tpu.pipeline_mode<synchronous>, transform_indices = @transform_2, window_bounds = array<i64: 5, 16, 64>}, {pipeline_mode = #tpu.pipeline_mode<synchronous>, transform_indices = @transform_3, window_bounds = array<i64: 1, 64>}, {transform_indices = @transform_4, window_bounds = array<i64: 256, 64>}]} {
    %c256_i32 = arith.constant 256 : i32
    %0 = arith.muli %arg0, %c256_i32 : i32
    %1 = tpu.assume_multiple %0, 8 : i32
    %cst = arith.constant 0.000000e+00 : f32
    %2 = vector.broadcast %cst : f32 to vector<256x64xf32>
    %c0_i32 = arith.constant 0 : i32
    %3 = arith.addi %1, %c0_i32 : i32
    %4 = arith.index_cast %3 : i32 to index
    %c0 = arith.constant 0 : index
    %5 = vector.load %arg2[%4, %c0] : memref<800x16xf32, #tpu.memory_space<vmem>>, vector<256x16xf32>
    %c0_0 = arith.constant 0 : index
    %c0_1 = arith.constant 0 : index
    %c0_2 = arith.constant 0 : index
    %6 = vector.load %arg3[%c0_0, %c0_1, %c0_2] : memref<5x16x64xf32, #tpu.memory_space<vmem>>, vector<1x16x64xf32>
    %7 = vector.shape_cast %6 : vector<1x16x64xf32> to vector<16x64xf32>
    %cst_3 = arith.constant dense<0.000000e+00> : vector<256x64xf32>
    %8 = tpu.matmul %5, %7, %cst_3 {dimension_numbers = #tpu.dot_dimension_numbers<[1], [0], [0], [1], [0, 0, 1, 1], [], []>} : vector<256x16xf32>, vector<16x64xf32>, vector<256x64xf32> -> vector<256x64xf32>
    %9 = arith.addf %2, %8 : vector<256x64xf32>
    %c8_i32 = arith.constant 8 : i32
    %10 = arith.addi %1, %c8_i32 : i32
    %11 = arith.index_cast %10 : i32 to index
    %c0_4 = arith.constant 0 : index
    %12 = vector.load %arg2[%11, %c0_4] : memref<800x16xf32, #tpu.memory_space<vmem>>, vector<256x16xf32>
    %c1 = arith.constant 1 : index
    %c0_5 = arith.constant 0 : index
    %c0_6 = arith.constant 0 : index
    %13 = vector.load %arg3[%c1, %c0_5, %c0_6] : memref<5x16x64xf32, #tpu.memory_space<vmem>>, vector<1x16x64xf32>
    %14 = vector.shape_cast %13 : vector<1x16x64xf32> to vector<16x64xf32>
    %cst_7 = arith.constant dense<0.000000e+00> : vector<256x64xf32>
    %15 = tpu.matmul %12, %14, %cst_7 {dimension_numbers = #tpu.dot_dimension_numbers<[1], [0], [0], [1], [0, 0, 1, 1], [], []>} : vector<256x16xf32>, vector<16x64xf32>, vector<256x64xf32> -> vector<256x64xf32>
    %16 = arith.addf %9, %15 : vector<256x64xf32>
    %c16_i32 = arith.constant 16 : i32
    %17 = arith.addi %1, %c16_i32 : i32
    %18 = arith.index_cast %17 : i32 to index
    %c0_8 = arith.constant 0 : index
    %19 = vector.load %arg2[%18, %c0_8] : memref<800x16xf32, #tpu.memory_space<vmem>>, vector<256x16xf32>
    %c2 = arith.constant 2 : index
    %c0_9 = arith.constant 0 : index
    %c0_10 = arith.constant 0 : index
    %20 = vector.load %arg3[%c2, %c0_9, %c0_10] : memref<5x16x64xf32, #tpu.memory_space<vmem>>, vector<1x16x64xf32>
    %21 = vector.shape_cast %20 : vector<1x16x64xf32> to vector<16x64xf32>
    %cst_11 = arith.constant dense<0.000000e+00> : vector<256x64xf32>
    %22 = tpu.matmul %19, %21, %cst_11 {dimension_numbers = #tpu.dot_dimension_numbers<[1], [0], [0], [1], [0, 0, 1, 1], [], []>} : vector<256x16xf32>, vector<16x64xf32>, vector<256x64xf32> -> vector<256x64xf32>
    %23 = arith.addf %16, %22 : vector<256x64xf32>
    %c24_i32 = arith.constant 24 : i32
    %24 = arith.addi %1, %c24_i32 : i32
    %25 = arith.index_cast %24 : i32 to index
    %c0_12 = arith.constant 0 : index
    %26 = vector.load %arg2[%25, %c0_12] : memref<800x16xf32, #tpu.memory_space<vmem>>, vector<256x16xf32>
    %c3 = arith.constant 3 : index
    %c0_13 = arith.constant 0 : index
    %c0_14 = arith.constant 0 : index
    %27 = vector.load %arg3[%c3, %c0_13, %c0_14] : memref<5x16x64xf32, #tpu.memory_space<vmem>>, vector<1x16x64xf32>
    %28 = vector.shape_cast %27 : vector<1x16x64xf32> to vector<16x64xf32>
    %cst_15 = arith.constant dense<0.000000e+00> : vector<256x64xf32>
    %29 = tpu.matmul %26, %28, %cst_15 {dimension_numbers = #tpu.dot_dimension_numbers<[1], [0], [0], [1], [0, 0, 1, 1], [], []>} : vector<256x16xf32>, vector<16x64xf32>, vector<256x64xf32> -> vector<256x64xf32>
    %30 = arith.addf %23, %29 : vector<256x64xf32>
    %c32_i32 = arith.constant 32 : i32
    %31 = arith.addi %1, %c32_i32 : i32
    %32 = arith.index_cast %31 : i32 to index
    %c0_16 = arith.constant 0 : index
    %33 = vector.load %arg2[%32, %c0_16] : memref<800x16xf32, #tpu.memory_space<vmem>>, vector<256x16xf32>
    %c4 = arith.constant 4 : index
    %c0_17 = arith.constant 0 : index
    %c0_18 = arith.constant 0 : index
    %34 = vector.load %arg3[%c4, %c0_17, %c0_18] : memref<5x16x64xf32, #tpu.memory_space<vmem>>, vector<1x16x64xf32>
    %35 = vector.shape_cast %34 : vector<1x16x64xf32> to vector<16x64xf32>
    %cst_19 = arith.constant dense<0.000000e+00> : vector<256x64xf32>
    %36 = tpu.matmul %33, %35, %cst_19 {dimension_numbers = #tpu.dot_dimension_numbers<[1], [0], [0], [1], [0, 0, 1, 1], [], []>} : vector<256x16xf32>, vector<16x64xf32>, vector<256x64xf32> -> vector<256x64xf32>
    %37 = arith.addf %30, %36 : vector<256x64xf32>
    %c0_20 = arith.constant 0 : index
    %c0_21 = arith.constant 0 : index
    %38 = vector.load %arg4[%c0_20, %c0_21] : memref<1x64xf32, #tpu.memory_space<vmem>>, vector<1x64xf32>
    %39 = vector.broadcast %38 : vector<1x64xf32> to vector<256x64xf32>
    %40 = arith.addf %37, %39 : vector<256x64xf32>
    %c0_22 = arith.constant 0 : index
    %c0_23 = arith.constant 0 : index
    %41 = vector.load %arg1[%c0_22, %c0_23] : memref<1x2xf32, #tpu.memory_space<vmem>>, vector<1x1xf32>
    %c0_24 = arith.constant 0 : index
    %c1_25 = arith.constant 1 : index
    %42 = vector.load %arg1[%c0_24, %c1_25] : memref<1x2xf32, #tpu.memory_space<vmem>>, vector<1x1xf32>
    %43 = math.tanh %40 : vector<256x64xf32>
    %44 = vector.broadcast %42 : vector<1x1xf32> to vector<256x64xf32>
    %45 = arith.subf %43, %44 : vector<256x64xf32>
    %46 = vector.broadcast %41 : vector<1x1xf32> to vector<256x64xf32>
    %47 = arith.mulf %45, %46 : vector<256x64xf32>
    %c0_26 = arith.constant 0 : index
    %c0_27 = arith.constant 0 : index
    %48 = vector.load %arg5[%c0_26, %c0_27] : memref<256x64xf32, #tpu.memory_space<vmem>>, vector<256x64xf32>
    tpu.vector_store %arg5[%c0_26, %c0_27], %47 {strides = array<i32>} : memref<256x64xf32, #tpu.memory_space<vmem>>, vector<256x64xf32>,
    return
  }
  func.func @transform_0(%arg0: i32) -> (i32, i32) {
    %c0_i32 = arith.constant 0 : i32
    %c0_i32_0 = arith.constant 0 : i32
    %c0_i32_1 = arith.constant 0 : i32
    return %c0_i32, %c0_i32_0 : i32, i32
  }
  func.func @transform_1(%arg0: i32) -> (i32, i32) {
    %c0_i32 = arith.constant 0 : i32
    %c0_i32_0 = arith.constant 0 : i32
    %c0_i32_1 = arith.constant 0 : i32
    return %c0_i32, %c0_i32_0 : i32, i32
  }
  func.func @transform_2(%arg0: i32) -> (i32, i32, i32) {
    %c0_i32 = arith.constant 0 : i32
    %c0_i32_0 = arith.constant 0 : i32
    %c0_i32_1 = arith.constant 0 : i32
    %c0_i32_2 = arith.constant 0 : i32
    return %c0_i32, %c0_i32_0, %c0_i32_1 : i32, i32, i32
  }
  func.func @transform_3(%arg0: i32) -> (i32, i32) {
    %c0_i32 = arith.constant 0 : i32
    %c0_i32_0 = arith.constant 0 : i32
    %c0_i32_1 = arith.constant 0 : i32
    return %c0_i32, %c0_i32_0 : i32, i32
  }
  func.func @transform_4(%arg0: i32) -> (i32, i32) {
    %c0_i32 = arith.constant 0 : i32
    %c0_i32_0 = arith.constant 0 : i32
    return %arg0, %c0_i32 : i32, i32
  }
}

</mosaic_0001>

<bundles_post_ra>
// kernel: tpu_custom_call.1
= control target key start
LH: loop header
LB: loop body
LE: loop exit
PB: predicated region body
PF: predicated region fallthrough
CT: control target
= control target key end

     0   :  { %s3307_s15 = smov 0   ;;  %s3980_s0 = inlined_call_operand.vmem [shape: f32[1,2], index: 0, kind: input, shape index: {}]   ;;  %s3981_s1 = inlined_call_operand.vmem [shape: f32[800,16], index: 1, kind: input, shape index: {}]   ;;  %s3982_s2 = inlined_call_operand.vmem [shape: f32[5,16,64], index: 2, kind: input, shape index: {}]   ;;  %s3983_s3 = inlined_call_operand.vmem [shape: f32[1,64], index: 3, kind: input, shape index: {}]   ;;  %s3984_s4 = inlined_call_operand.vmem [shape: f32[768,64], index: 4, kind: output, shape index: {}]  }
   0x1 LB: > { %s2305_s16 = sadd.s32 4294967295, %s3278_s15   ;;  %p2308_p0 = scmp.ge.s32.totalorder %s3278_s15, 1  ;;  %s3278_s15 = sphi %s3307_s15, %s14_s15  }
   0x2   : > { %p152_p1 = scmp.lt.s32.totalorder %s3278_s15, 4 }
   0x4   : > { %p153_p2 = pnand %p2308_p0, %p152_p1 }
   0x5   : > { %v2345_v0 = vld [vmem:[%s3982_s2 + $0x10] sm:$0xff] (!%p153_p2)  ;;  %v2346_v1 = vld [vmem:[%s3982_s2 + $0x18] sm:$0xff] (!%p153_p2)  ;;  %v2444_v2 = vld [vmem:[%s3982_s2 + $0x20] sm:$0xff] (!%p153_p2)  ;;  %s2311_s23 = sshll.u32 (!%p153_p2), %s2305_s16, 8  ;;  %vm252_vm0 = vcmask (!%p153_p2), 130048   ;;  %v3280_v35 = vmov (!%p153_p2), 1  }
   0x6   : > { %156 = sbr.rel (%p153_p2) target bundleno = 403 (0x193), region = 36  ;;  %v3046_v3 = vpack.c.bf16 (!%p153_p2), %v2346_v1, %v2345_v0  ;;  %v2445_v4 = vld [vmem:[%s3982_s2 + $0x28] sm:$0xff] (!%p153_p2)  ;;  %s3332_s28 = scalar_lea.vmem (!%p153_p2), %s3981_s1, %s2311_s23  ;;  %v213_v5 = vld [vmem:[%s3982_s2] sm:$0xff] (!%p153_p2)  ;;  %v2511_v11 = vld [vmem:[%s3982_s2 + $0x30] sm:$0xff] (!%p153_p2)  ;;  %3206 = vset.pattern.permute.xlu0 (!%p153_p2), %v3280_v35  ;;  %v3281_v38 = vmov (!%p153_p2), 0   ;;  %vm2214_vm1 = vcmask (!%p153_p2), 523264  }
   0x7   : > { %v214_v6 = vld [vmem:[%s3982_s2 + $0x8] sm:$0xff] (!%p153_p2)  ;;  %v3340_v7 = vpack.c.bf16 (!%p153_p2), %v2445_v4, %v2444_v2  ;;  %v3346_v9 = vld [vmem:[%s3332_s28 + $0x10] sm:$0xff] (!%p153_p2)  ;;  %v2512_v12 = vld [vmem:[%s3982_s2 + $0x38] sm:$0xff] (!%p153_p2)  ;;  %s2309_s21 = sshll.u32 (!%p153_p2), %s2305_s16, 5 }
   0x8   : > { %v3343_v8 = vld [vmem:[%s3332_s28 + $0x8] sm:$0xff] (!%p153_p2)  ;;  %v3050_v10 = vpack.c.bf16 (!%p153_p2), %v214_v6, %v213_v5  ;;  %3047 = vmatprep.subr.bf16.mxu1 (!%p153_p2), %v3046_v3  ;;  %v3058_v13 = vpack.c.bf16 (!%p153_p2), %v2512_v12, %v2511_v11  ;;  %2894 = vmatprep.mubr.msk.f32.mxu0 (!%p153_p2), %vm252_vm0, %v3346_v9  ;;  %v3361_v14 = vld [vmem:[%s3332_s28 + $0x18] sm:$0xff] (!%p153_p2)  ;;  %v3366_v15 = vld [vmem:[%s3332_s28 + $0x20] sm:$0xff] (!%p153_p2)  ;;  %p174_p3 = scmp.lt.s32.totalorder (!%p153_p2), %s2309_s21, 95 }
   0x9   : > { %2790 = vmatprep.mubr.msk.f32.mxu1 (!%p153_p2), %vm252_vm0, %v3343_v8  ;;  %3055 = vmatprep.subr.bf16.mxu0 (!%p153_p2), %v3340_v7  ;;  %v2578_v16 = vld [vmem:[%s3982_s2 + $0x40] sm:$0xff] (!%p153_p2)  ;;  %v3376_v17 = vld [vmem:[%s3332_s28 + $0x28] sm:$0xff] (!%p153_p2)  ;;  %v3384_v19 = vld [vmem:[%s3332_s28 + $0x30] sm:$0xff] (!%p153_p2) }
   0xa   : > { %3049 = vmatpush3.bf16.msra.mxu1 (!%p153_p2), %v3046_v3  ;;  %3057 = vmatpush3.bf16.msra.mxu0 (!%p153_p2), %v3340_v7  ;;  %v2579_v18 = vld [vmem:[%s3982_s2 + $0x48] sm:$0xff] (!%p153_p2)  ;;  %v3396_v21 = vld [vmem:[%s3332_s28 + $0x38] sm:$0xff] (!%p153_p2)  ;;  %v3399_v22 = vld [vmem:[%s3332_s28 + $0x40] sm:$0xff] (!%p153_p2) }
   0xb   : > { %3051 = vmatprep.subr.bf16.mxu1 (!%p153_p2), %v3050_v10  ;;  %3059 = vmatprep.subr.bf16.mxu0 (!%p153_p2), %v3058_v13  ;;  %v3062_v20 = vpack.c.bf16 (!%p153_p2), %v2579_v18, %v2578_v16  ;;  %v3410_v23 = vld [vmem:[%s3332_s28 + $0x48] sm:$0xff] (!%p153_p2)  ;;  %v3413_v24 = vld [vmem:[%s3332_s28 + $0x50] sm:$0xff] (!%p153_p2)  ;;  %v3424_v25 = vld [vmem:[%s3332_s28 + $0x58] sm:$0xff] (!%p153_p2) }
   0xc   : > { %v3427_v26 = vld [vmem:[%s3332_s28 + $0x60] sm:$0xff] (!%p153_p2)  ;;  %v3438_v27 = vld [vmem:[%s3332_s28 + $0x68] sm:$0xff] (!%p153_p2)  ;;  %v3441_v28 = vld [vmem:[%s3332_s28 + $0x70] sm:$0xff] (!%p153_p2) }
   0xd   : > { %2791 = vmatmul.mubr.msk.f32.vlgmr.msra.gmra.mrb[0].mxu1 %vm252_vm0, %v3346_v9  ;;  %2895 = vmatmul.mubr.msk.f32.vlgmr.msra.gmra.mrb[0].mxu0 %vm252_vm0, %v3361_v14  ;;  %v3452_v29 = vld [vmem:[%s3332_s28 + $0x78] sm:$0xff]  ;;  %v3455_v30 = vld [vmem:[%s3332_s28 + $0x80] sm:$0xff]  ;;  %v3466_v31 = vld [vmem:[%s3332_s28 + $0x88] sm:$0xff]  ;;  %s3986_s21 = smov (!%p174_p3, %s2309_s21), 95 }
   0xe   : > { %3053 = vmatpush3.bf16.msra.mxu1 %v3050_v10  ;;  %3061 = vmatpush3.bf16.msra.mxu0 %v3058_v13  ;;  %v3475_v32 = vld [vmem:[%s3332_s28 + $0x90] sm:$0xff]  ;;  %v2613_v33 = vld [vmem:[%s3980_s0] ss:$0 sm:$0xff]  ;;  %v3483_v34 = vld [vmem:[%s3332_s28 + $0x98] sm:$0xff]  ;;  %s2310_s16 = sshll.u32 %s3986_s21, 3 }
   0xf   : > { %2793 = vmatprep.mubr.msk.f32.mxu1 %vm252_vm0, %v3361_v14  ;;  %2897 = vmatprep.mubr.msk.f32.mxu0 %vm252_vm0, %v3366_v15  ;;  %v3492_v36 = vld [vmem:[%s3332_s28 + $0xa0] sm:$0xff]  ;;  %v3497_v37 = vld [vmem:[%s3332_s28 + $0xa8] sm:$0xff]  ;;  %v3506_v39 = vld [vmem:[%s3332_s28 + $0xb0] sm:$0xff]  ;;  %s3818_s24 = scalar_lea.vmem %s3984_s4, %s2310_s16 }
  0x10   : > { %3066 = vmatprep.subr.bf16.mxu1 %v3340_v7  ;;  %3063 = vmatprep.subr.bf16.mxu0 %v3062_v20  ;;  %v3511_v40 = vld [vmem:[%s3332_s28 + $0xb8] sm:$0xff]  ;;  %v3520_v41 = vld [vmem:[%s3332_s28 + $0xc0] sm:$0xff]  ;;  %v3525_v42 = vld [vmem:[%s3332_s28 + $0xc8] sm:$0xff] }
  0x11   : > { %2794 = vmatmul.mubr.msk.f32.gmra.mrb[2].mxu1 %vm252_vm0, %v3366_v15  ;;  %2898 = vmatmul.mubr.msk.f32.gmra.mrb[2].mxu0 %vm252_vm0, %v3376_v17  ;;  %v3534_v43 = vld [vmem:[%s3332_s28 + $0xd0] sm:$0xff]  ;;  %v3539_v44 = vld [vmem:[%s3332_s28 + $0xd8] sm:$0xff]  ;;  %v3548_v45 = vld [vmem:[%s3332_s28 + $0xe0] sm:$0xff] }
  0x12   : > { %2796 = vmatprep.mubr.msk.f32.mxu1 %vm252_vm0, %v3376_v17  ;;  %2900 = vmatprep.mubr.msk.f32.mxu0 %vm252_vm0, %v3384_v19  ;;  %v3553_v46 = vld [vmem:[%s3332_s28 + $0xe8] sm:$0xff]  ;;  %v3562_v47 = vld [vmem:[%s3332_s28 + $0xf0] sm:$0xff]  ;;  %v3567_v48 = vld [vmem:[%s3332_s28 + $0xf8] sm:$0xff] }
  0x13   : > { %2143 = vperm.xlu0 %3206, %v2613_v33   ;;  %v3576_v49 = vld [vmem:[%s3332_s28 + $0x100] sm:$0xff]  ;;  %v3638_v51 = vld [vmem:[%s3332_s28 + $0x108] sm:$0xff]  ;;  %v3649_v52 = vld [vmem:[%s3332_s28 + $0x110] sm:$0xff] }
  0x14   : > { %v181_v50 = vld [vmem:[%s3332_s28] sm:$0xff]  ;;  %v2577_v53 = vld [vmem:[%s3332_s28 + $0x118] sm:$0xff] }
  0x15   : > { %2797 = vmatmul.mubr.msk.f32.gmra.mrb[4].mxu1 %vm252_vm0, %v3384_v19  ;;  %2901 = vmatmul.mubr.msk.f32.gmra.mrb[4].mxu0 %vm252_vm0, %v3396_v21 }
  0x16   : > { %2799 = vmatprep.mubr.msk.f32.mxu1 %vm252_vm0, %v3396_v21  ;;  %2903 = vmatprep.mubr.msk.f32.mxu0 %vm252_vm0, %v3399_v22 }
  0x17   : > { %3207 = vset.pattern.permute.xlu0 %v3281_v38 }
  0x18   : > { %2179 = vperm.xlu0 %3207, %v2613_v33  }
  0x19   : > { %2800 = vmatmul.mubr.msk.f32.gmra.mrb[6].mxu1 %vm252_vm0, %v3399_v22  ;;  %2904 = vmatmul.mubr.msk.f32.gmra.mrb[6].mxu0 %vm252_vm0, %v3410_v23 }
  0x1a   : > { %2802 = vmatprep.mubr.msk.f32.mxu1 %vm252_vm0, %v3410_v23  ;;  %2906 = vmatprep.mubr.msk.f32.mxu0 %vm252_vm0, %v3413_v24 }
  0x1d   : > { %2803 = vmatmul.mubr.msk.f32.gmra.mrb[8].mxu1 %vm252_vm0, %v3413_v24  ;;  %2907 = vmatmul.mubr.msk.f32.gmra.mrb[8].mxu0 %vm252_vm0, %v3424_v25 }
  0x1e   : > { %2805 = vmatprep.mubr.msk.f32.mxu1 %vm252_vm0, %v3424_v25  ;;  %2909 = vmatprep.mubr.msk.f32.mxu0 %vm252_vm0, %v3427_v26 }
  0x21   : > { %2806 = vmatmul.mubr.msk.f32.gmra.mrb[10].mxu1 %vm252_vm0, %v3427_v26  ;;  %2910 = vmatmul.mubr.msk.f32.gmra.mrb[10].mxu0 %vm252_vm0, %v3438_v27 }
  0x22   : > { %2808 = vmatprep.mubr.msk.f32.mxu1 %vm252_vm0, %v3438_v27  ;;  %2912 = vmatprep.mubr.msk.f32.mxu0 %vm252_vm0, %v3441_v28 }
  0x25   : > { %2809 = vmatmul.mubr.msk.f32.gmra.mrb[12].mxu1 %vm252_vm0, %v3441_v28  ;;  %2913 = vmatmul.mubr.msk.f32.gmra.mrb[12].mxu0 %vm252_vm0, %v3452_v29 }
  0x26   : > { %2811 = vmatprep.mubr.msk.f32.mxu1 %vm252_vm0, %v3452_v29  ;;  %2915 = vmatprep.mubr.msk.f32.mxu0 %vm252_vm0, %v3455_v30 }
  0x29   : > { %2812 = vmatmul.mubr.msk.f32.gmra.mrb[14].mxu1 %vm252_vm0, %v3455_v30  ;;  %2916 = vmatmul.mubr.msk.f32.gmra.mrb[14].mxu0 %vm252_vm0, %v3466_v31 }
  0x2a   : > { %2814 = vmatprep.mubr.msk.f32.mxu1 %vm252_vm0, %v3466_v31  ;;  %2946 = vmatprep.mubr.msk.f32.mxu0 %vm252_vm0, %v3361_v14 }
  0x2d   : > { %2815 = vmatmul.mubr.msk.f32.gmra.mrb[16].mxu1 %vm252_vm0, %v3475_v32  ;;  %2947 = vmatmul.mubr.msk.f32.vlgmr.msra.gmra.mrb[0].mxu0 %vm252_vm0, %v3366_v15 }
  0x2e   : > { %2817 = vmatprep.mubr.msk.f32.mxu1 %vm252_vm0, %v3483_v34  ;;  %3065 = vmatpush3.bf16.msra.mxu0 %v3062_v20 }
  0x2f   : > { %2949 = vmatprep.mubr.msk.f32.mxu0 %vm252_vm0, %v3376_v17 }
  0x31   : > { %2818 = vmatmul.mubr.msk.f32.gmra.mrb[18].mxu1 %vm252_vm0, %v3492_v36  ;;  %2950 = vmatmul.mubr.msk.f32.gmra.mrb[2].mxu0 %vm252_vm0, %v3384_v19 }
  0x32   : > { %2820 = vmatprep.mubr.msk.f32.mxu1 %vm252_vm0, %v3497_v37  ;;  %2952 = vmatprep.mubr.msk.f32.mxu0 %vm252_vm0, %v3396_v21 }
  0x35   : > { %2821 = vmatmul.mubr.msk.f32.gmra.mrb[20].mxu1 %vm252_vm0, %v3506_v39  ;;  %2953 = vmatmul.mubr.msk.f32.gmra.mrb[4].mxu0 %vm252_vm0, %v3399_v22 }
  0x36   : > { %2823 = vmatprep.mubr.msk.f32.mxu1 %vm252_vm0, %v3511_v40  ;;  %2955 = vmatprep.mubr.msk.f32.mxu0 %vm252_vm0, %v3410_v23 }
  0x39   : > { %2824 = vmatmul.mubr.msk.f32.gmra.mrb[22].mxu1 %vm252_vm0, %v3520_v41  ;;  %2956 = vmatmul.mubr.msk.f32.gmra.mrb[6].mxu0 %vm252_vm0, %v3413_v24 }
  0x3a   : > { %2826 = vmatprep.mubr.msk.f32.mxu1 %vm252_vm0, %v3525_v42  ;;  %2958 = vmatprep.mubr.msk.f32.mxu0 %vm252_vm0, %v3424_v25 }
  0x3d   : > { %2827 = vmatmul.mubr.msk.f32.gmra.mrb[24].mxu1 %vm252_vm0, %v3534_v43  ;;  %2959 = vmatmul.mubr.msk.f32.gmra.mrb[8].mxu0 %vm252_vm0, %v3427_v26 }
  0x3e   : > { %2829 = vmatprep.mubr.msk.f32.mxu1 %vm252_vm0, %v3539_v44  ;;  %2961 = vmatprep.mubr.msk.f32.mxu0 %vm252_vm0, %v3438_v27 }
  0x41   : > { %2830 = vmatmul.mubr.msk.f32.gmra.mrb[26].mxu1 %vm252_vm0, %v3548_v45  ;;  %2962 = vmatmul.mubr.msk.f32.gmra.mrb[10].mxu0 %vm252_vm0, %v3441_v28 }
  0x42   : > { %2832 = vmatprep.mubr.msk.f32.mxu1 %vm252_vm0, %v3553_v46  ;;  %2964 = vmatprep.mubr.msk.f32.mxu0 %vm252_vm0, %v3452_v29 }
  0x45   : > { %2833 = vmatmul.mubr.msk.f32.gmra.mrb[28].mxu1 %vm252_vm0, %v3562_v47  ;;  %2965 = vmatmul.mubr.msk.f32.gmra.mrb[12].mxu0 %vm252_vm0, %v3455_v30 }
  0x46   : > { %2835 = vmatprep.mubr.msk.f32.mxu1 %vm252_vm0, %v3567_v48  ;;  %2967 = vmatprep.mubr.msk.f32.mxu0 %vm252_vm0, %v3466_v31 }
  0x49   : > { %2836 = vmatmul.mubr.msk.f32.gmra.mrb[30].mxu1 %vm252_vm0, %v3576_v49  ;;  %2968 = vmatmul.mubr.msk.f32.gmra.mrb[14].mxu0 %vm252_vm0, %v3475_v32 }
  0x4a   : > { %2842 = vmatprep.mubr.msk.f32.mxu1 %vm252_vm0, %v181_v50  ;;  %2970 = vmatprep.mubr.msk.f32.mxu0 %vm252_vm0, %v3483_v34 }
  0x4d   : > { %2843 = vmatmul.mubr.msk.f32.vlgmr.msra.gmra.mrb[0].mxu1 %vm252_vm0, %v3343_v8  ;;  %2971 = vmatmul.mubr.msk.f32.gmra.mrb[16].mxu0 %vm252_vm0, %v3492_v36 }
  0x4e   : > { %3067 = vmatpush3.bf16.msra.mxu1 %v3340_v7  ;;  %2845 = vmatprep.mubr.msk.f32.mxu1 %vm252_vm0, %v3346_v9  ;;  %v3798_v7 = vld [vmem:[%s3983_s3] ss:$0 sm:$0xff] }
  0x4f   : > { %2973 = vmatprep.mubr.msk.f32.mxu0 %vm252_vm0, %v3497_v37 }
  0x51   : > { %2846 = vmatmul.mubr.msk.f32.gmra.mrb[2].mxu1 %vm252_vm0, %v3361_v14  ;;  %2974 = vmatmul.mubr.msk.f32.gmra.mrb[18].mxu0 %vm252_vm0, %v3506_v39 }
  0x52   : > { %2848 = vmatprep.mubr.msk.f32.mxu1 %vm252_vm0, %v3366_v15  ;;  %2976 = vmatprep.mubr.msk.f32.mxu0 %vm252_vm0, %v3511_v40 }
  0x55   : > { %2849 = vmatmul.mubr.msk.f32.gmra.mrb[4].mxu1 %vm252_vm0, %v3376_v17  ;;  %2977 = vmatmul.mubr.msk.f32.gmra.mrb[20].mxu0 %vm252_vm0, %v3520_v41 }
  0x56   : > { %2851 = vmatprep.mubr.msk.f32.mxu1 %vm252_vm0, %v3384_v19  ;;  %2979 = vmatprep.mubr.msk.f32.mxu0 %vm252_vm0, %v3525_v42 }
  0x59   : > { %2852 = vmatmul.mubr.msk.f32.gmra.mrb[6].mxu1 %vm252_vm0, %v3396_v21  ;;  %2980 = vmatmul.mubr.msk.f32.gmra.mrb[22].mxu0 %vm252_vm0, %v3534_v43 }
  0x5a   : > { %2854 = vmatprep.mubr.msk.f32.mxu1 %vm252_vm0, %v3399_v22  ;;  %2982 = vmatprep.mubr.msk.f32.mxu0 %vm252_vm0, %v3539_v44 }
  0x5d   : > { %2855 = vmatmul.mubr.msk.f32.gmra.mrb[8].mxu1 %vm252_vm0, %v3410_v23  ;;  %2983 = vmatmul.mubr.msk.f32.gmra.mrb[24].mxu0 %vm252_vm0, %v3548_v45 }
  0x5e   : > { %2857 = vmatprep.mubr.msk.f32.mxu1 %vm252_vm0, %v3413_v24  ;;  %2985 = vmatprep.mubr.msk.f32.mxu0 %vm252_vm0, %v3553_v46 }
  0x61   : > { %2858 = vmatmul.mubr.msk.f32.gmra.mrb[10].mxu1 %vm252_vm0, %v3424_v25  ;;  %2986 = vmatmul.mubr.msk.f32.gmra.mrb[26].mxu0 %vm252_vm0, %v3562_v47 }
  0x62   : > { %2860 = vmatprep.mubr.msk.f32.mxu1 %vm252_vm0, %v3427_v26  ;;  %2988 = vmatprep.mubr.msk.f32.mxu0 %vm252_vm0, %v3567_v48 }
  0x65   : > { %2861 = vmatmul.mubr.msk.f32.gmra.mrb[12].mxu1 %vm252_vm0, %v3438_v27  ;;  %2989 = vmatmul.mubr.msk.f32.gmra.mrb[28].mxu0 %vm252_vm0, %v3576_v49 }
  0x66   : > { %2863 = vmatprep.mubr.msk.f32.mxu1 %vm252_vm0, %v3441_v28  ;;  %2991 = vmatprep.mubr.msk.f32.mxu0 %vm252_vm0, %v3638_v51 }
  0x69   : > { %2864 = vmatmul.mubr.msk.f32.gmra.mrb[14].mxu1 %vm252_vm0, %v3452_v29  ;;  %2992 = vmatmul.mubr.msk.f32.gmra.mrb[30].mxu0 %vm252_vm0, %v3649_v52 }
  0x6a   : > { %2866 = vmatprep.mubr.msk.f32.mxu1 %vm252_vm0, %v3455_v30  ;;  %2998 = vmatprep.mubr.msk.f32.mxu0 %vm252_vm0, %v3366_v15 }
  0x6d   : > { %2867 = vmatmul.mubr.msk.f32.gmra.mrb[16].mxu1 %vm252_vm0, %v3466_v31  ;;  %2999 = vmatmul.mubr.msk.f32.vlgmr.msra.gmra.mrb[0].mxu0 %vm252_vm0, %v3376_v17 }
  0x6e   : > { %2869 = vmatprep.mubr.msk.f32.mxu1 %vm252_vm0, %v3475_v32  ;;  %3001 = vmatprep.mubr.msk.f32.mxu0 %vm252_vm0, %v3384_v19 }
  0x71   : > { %2870 = vmatmul.mubr.msk.f32.gmra.mrb[18].mxu1 %vm252_vm0, %v3483_v34  ;;  %3002 = vmatmul.mubr.msk.f32.gmra.mrb[2].mxu0 %vm252_vm0, %v3396_v21 }
  0x72   : > { %2872 = vmatprep.mubr.msk.f32.mxu1 %vm252_vm0, %v3492_v36  ;;  %3004 = vmatprep.mubr.msk.f32.mxu0 %vm252_vm0, %v3399_v22 }
  0x75   : > { %2873 = vmatmul.mubr.msk.f32.gmra.mrb[20].mxu1 %vm252_vm0, %v3497_v37  ;;  %3005 = vmatmul.mubr.msk.f32.gmra.mrb[4].mxu0 %vm252_vm0, %v3410_v23 }
  0x76   : > { %2875 = vmatprep.mubr.msk.f32.mxu1 %vm252_vm0, %v3506_v39  ;;  %3007 = vmatprep.mubr.msk.f32.mxu0 %vm252_vm0, %v3413_v24 }
  0x79   : > { %2876 = vmatmul.mubr.msk.f32.gmra.mrb[22].mxu1 %vm252_vm0, %v3511_v40  ;;  %3008 = vmatmul.mubr.msk.f32.gmra.mrb[6].mxu0 %vm252_vm0, %v3424_v25 }
  0x7a   : > { %2878 = vmatprep.mubr.msk.f32.mxu1 %vm252_vm0, %v3520_v41  ;;  %3010 = vmatprep.mubr.msk.f32.mxu0 %vm252_vm0, %v3427_v26 }
  0x7d   : > { %2879 = vmatmul.mubr.msk.f32.gmra.mrb[24].mxu1 %vm252_vm0, %v3525_v42  ;;  %3011 = vmatmul.mubr.msk.f32.gmra.mrb[8].mxu0 %vm252_vm0, %v3438_v27 }
  0x7e   : > { %2881 = vmatprep.mubr.msk.f32.mxu1 %vm252_vm0, %v3534_v43  ;;  %3013 = vmatprep.mubr.msk.f32.mxu0 %vm252_vm0, %v3441_v28 }
  0x81   : > { %2882 = vmatmul.mubr.msk.f32.gmra.mrb[26].mxu1 %vm252_vm0, %v3539_v44  ;;  %3014 = vmatmul.mubr.msk.f32.gmra.mrb[10].mxu0 %vm252_vm0, %v3452_v29 }
  0x82   : > { %2884 = vmatprep.mubr.msk.f32.mxu1 %vm252_vm0, %v3548_v45  ;;  %3016 = vmatprep.mubr.msk.f32.mxu0 %vm252_vm0, %v3455_v30 }
  0x85   : > { %2885 = vmatmul.mubr.msk.f32.gmra.mrb[28].mxu1 %vm252_vm0, %v3553_v46  ;;  %3017 = vmatmul.mubr.msk.f32.gmra.mrb[12].mxu0 %vm252_vm0, %v3466_v31 }
  0x86   : > { %2887 = vmatprep.mubr.msk.f32.mxu1 %vm252_vm0, %v3562_v47  ;;  %3019 = vmatprep.mubr.msk.f32.mxu0 %vm252_vm0, %v3475_v32 }
  0x89   : > { %2888 = vmatmul.mubr.msk.f32.gmra.mrb[30].mxu1 %vm252_vm0, %v3567_v48  ;;  %3020 = vmatmul.mubr.msk.f32.gmra.mrb[14].mxu0 %vm252_vm0, %v3483_v34 }
  0x8a   : > { %2918 = vmatprep.mubr.msk.f32.mxu1 %vm252_vm0, %v3475_v32  ;;  %3022 = vmatprep.mubr.msk.f32.mxu0 %vm252_vm0, %v3492_v36 }
  0x8d   : > { %2919 = vmatmul.mubr.msk.f32.vlgmr.msra.gmra.mrb[16].mxu1 %vm252_vm0, %v3483_v34  ;;  %3023 = vmatmul.mubr.msk.f32.gmra.mrb[16].mxu0 %vm252_vm0, %v3497_v37 }
  0x8e   : > { %2921 = vmatprep.mubr.msk.f32.mxu1 %vm252_vm0, %v3492_v36  ;;  %3025 = vmatprep.mubr.msk.f32.mxu0 %vm252_vm0, %v3506_v39 }
  0x91   : > { %2922 = vmatmul.mubr.msk.f32.gmra.mrb[18].mxu1 %vm252_vm0, %v3497_v37  ;;  %3026 = vmatmul.mubr.msk.f32.gmra.mrb[18].mxu0 %vm252_vm0, %v3511_v40 }
  0x92   : > { %2924 = vmatprep.mubr.msk.f32.mxu1 %vm252_vm0, %v3506_v39  ;;  %3028 = vmatprep.mubr.msk.f32.mxu0 %vm252_vm0, %v3520_v41  ;;  %v3806_v22 = vpop.permute.xlu0 %2143 }
  0x95   : > { %2925 = vmatmul.mubr.msk.f32.gmra.mrb[20].mxu1 %vm252_vm0, %v3511_v40  ;;  %3029 = vmatmul.mubr.msk.f32.gmra.mrb[20].mxu0 %vm252_vm0, %v3525_v42 }
  0x96   : > { %2927 = vmatprep.mubr.msk.f32.mxu1 %vm252_vm0, %v3520_v41  ;;  %3031 = vmatprep.mubr.msk.f32.mxu0 %vm252_vm0, %v3534_v43 }
  0x97   : > { %v3811_v32 = vpop.permute.xlu0 %2179 }
  0x99   : > { %2928 = vmatmul.mubr.msk.f32.gmra.mrb[22].mxu1 %vm252_vm0, %v3525_v42  ;;  %3032 = vmatmul.mubr.msk.f32.gmra.mrb[22].mxu0 %vm252_vm0, %v3539_v44 }
  0x9a   : > { %2930 = vmatprep.mubr.msk.f32.mxu1 %vm252_vm0, %v3534_v43  ;;  %3034 = vmatprep.mubr.msk.f32.mxu0 %vm252_vm0, %v3548_v45 }
  0x9d   : > { %2931 = vmatmul.mubr.msk.f32.gmra.mrb[24].mxu1 %vm252_vm0, %v3539_v44  ;;  %3035 = vmatmul.mubr.msk.f32.gmra.mrb[24].mxu0 %vm252_vm0, %v3553_v46 }
  0x9e   : > { %2933 = vmatprep.mubr.msk.f32.mxu1 %vm252_vm0, %v3548_v45  ;;  %3037 = vmatprep.mubr.msk.f32.mxu0 %vm252_vm0, %v3562_v47 }
  0xa1   : > { %2934 = vmatmul.mubr.msk.f32.gmra.mrb[26].mxu1 %vm252_vm0, %v3553_v46  ;;  %3038 = vmatmul.mubr.msk.f32.gmra.mrb[26].mxu0 %vm252_vm0, %v3567_v48 }
  0xa2   : > { %2936 = vmatprep.mubr.msk.f32.mxu1 %vm252_vm0, %v3562_v47  ;;  %3040 = vmatprep.mubr.msk.f32.mxu0 %vm252_vm0, %v3576_v49 }
  0xa5   : > { %2937 = vmatmul.mubr.msk.f32.gmra.mrb[28].mxu1 %vm252_vm0, %v3567_v48  ;;  %3041 = vmatmul.mubr.msk.f32.gmra.mrb[28].mxu0 %vm252_vm0, %v3638_v51 }
  0xa6   : > { %2939 = vmatprep.mubr.msk.f32.mxu1 %vm252_vm0, %v3576_v49  ;;  %3043 = vmatprep.mubr.msk.f32.mxu0 %vm252_vm0, %v3649_v52 }
  0xa9   : > { %2940 = vmatmul.mubr.msk.f32.gmra.mrb[30].mxu1 %vm252_vm0, %v3638_v51  ;;  %3044 = vmatmul.mubr.msk.f32.gmra.mrb[30].mxu0 %vm252_vm0, %v2577_v53 }
 0x120   : > { %v2844_v54 = vpop.f32.mrb[0].mxu1 }
 0x121   : > { %v736_v55 = vpop.f32.mrb[1].mxu1 }
 0x124   : > { %v2847_v56 = vpop.f32.mrb[2].mxu1 }
 0x125   : > { %v746_v57 = vpop.f32.mrb[3].mxu1 }
 0x128   : > { %v2850_v58 = vpop.f32.mrb[4].mxu1 }
 0x129   : > { %v756_v59 = vpop.f32.mrb[5].mxu1 }
 0x12c   : > { %v2853_v60 = vpop.f32.mrb[6].mxu1 }
 0x12d   : > { %v766_v61 = vpop.f32.mrb[7].mxu1 }
 0x130   : > { %v2856_v62 = vpop.f32.mrb[8].mxu1 }
 0x131   : > { %v776_v63 = vpop.f32.mrb[9].mxu1 }
 0x134   : > { %v3783_v0 = vpop.f32.mrb[10].mxu1 }
 0x135   : > { %v3785_v1 = vpop.f32.mrb[11].mxu1 }
 0x138   : > { %v3787_v2 = vpop.f32.mrb[12].mxu1 }
 0x139   : > { %v3789_v3 = vpop.f32.mrb[13].mxu1 }
 0x13c   : > { %v3791_v4 = vpop.f32.mrb[14].mxu1 }
 0x13d   : > { %v3793_v5 = vpop.f32.mrb[15].mxu1 }
 0x140   : > { %v3000_v6 = vpop.f32.mrb[0].mxu0 }
 0x141   : > { %v3068_v8 = vadd.f32 %v3000_v6, %v2844_v54  ;;  %v1874_v9 = vpop.f32.mrb[1].mxu0 }
 0x142   : > { %v3069_v10 = vadd.f32 %v1874_v9, %v736_v55 }
 0x143   : > { %v2073_v11 = vadd.f32 %v3068_v8, %v3798_v7 }
 0x144   : > { %v2072_v12 = vadd.f32 %v3069_v10, %v3798_v7  ;;  %v3003_v13 = vpop.f32.mrb[2].mxu0 }
 0x145   : > { %3208 = vtanh.f32 %v2073_v11  ;;  %v3070_v14 = vadd.f32 %v3003_v13, %v2847_v56  ;;  %v1884_v15 = vpop.f32.mrb[3].mxu0 }
 0x146   : > { %3210 = vtanh.f32 %v2072_v12  ;;  %v3071_v16 = vadd.f32 %v1884_v15, %v746_v57 }
 0x147   : > { %v2075_v17 = vadd.f32 %v3070_v14, %v3798_v7 }
 0x148   : > { %v2074_v18 = vadd.f32 %v3071_v16, %v3798_v7  ;;  %v3006_v19 = vpop.f32.mrb[4].mxu0 }
 0x149   : > { %3212 = vtanh.f32 %v2075_v17  ;;  %v3072_v20 = vadd.f32 %v3006_v19, %v2850_v58  ;;  %v1894_v21 = vpop.f32.mrb[5].mxu0 }
 0x14a   : > { %3214 = vtanh.f32 %v2074_v18  ;;  %v3073_v23 = vadd.f32 %v1894_v21, %v756_v59 }
 0x14b   : > { %v2077_v24 = vadd.f32 %v3072_v20, %v3798_v7 }
 0x14c   : > { %v2076_v25 = vadd.f32 %v3073_v23, %v3798_v7  ;;  %v3009_v26 = vpop.f32.mrb[6].mxu0 }
 0x14d   : > { %3216 = vtanh.f32 %v2077_v24  ;;  %v3074_v27 = vadd.f32 %v3009_v26, %v2853_v60  ;;  %v1904_v28 = vpop.f32.mrb[7].mxu0 }
 0x14e   : > { %3218 = vtanh.f32 %v2076_v25  ;;  %v3075_v29 = vadd.f32 %v1904_v28, %v766_v61 }
 0x14f   : > { %v3209_v30 = vpop.eup %3208  ;;  %v2079_v31 = vadd.f32 %v3074_v27, %v3798_v7 }
 0x150   : > { %v3211_v33 = vpop.eup %3210  ;;  %v2078_v34 = vadd.f32 %v3075_v29, %v3798_v7  ;;  %v3012_v35 = vpop.f32.mrb[8].mxu0  ;;  %v2147_v36 = vsub.f32 %v3209_v30, %v3806_v22 }
 0x151   : > { %3220 = vtanh.f32 %v2079_v31  ;;  %v3076_v37 = vadd.f32 %v3012_v35, %v2856_v62  ;;  %v2146_v38 = vsub.f32 %v3211_v33, %v3806_v22  ;;  %v1914_v39 = vpop.f32.mrb[9].mxu0 }
 0x152   : > { %3222 = vtanh.f32 %v2078_v34  ;;  %v2183_v40 = vmul.f32 %v3811_v32, %v2147_v36  ;;  %v3077_v41 = vadd.f32 %v1914_v39, %v776_v63 }
 0x153   : > { %v3213_v42 = vpop.eup %3212  ;;  %v2081_v43 = vadd.f32 %v3076_v37, %v3798_v7  ;;  %v2182_v44 = vmul.f32 %v3811_v32, %v2146_v38 }
 0x154   : > { %v3215_v45 = vpop.eup %3214  ;;  %v2149_v46 = vsub.f32 %v3213_v42, %v3806_v22  ;;  %2216 = vst.msk [vmem:[%s3818_s24 + $0x8] sm:$0xff] %vm2214_vm1, %v2183_v40  ;;  %v2080_v47 = vadd.f32 %v3077_v41, %v3798_v7  ;;  %v3015_v48 = vpop.f32.mrb[10].mxu0 }
 0x155   : > { %3224 = vtanh.f32 %v2081_v43  ;;  %v2148_v49 = vsub.f32 %v3215_v45, %v3806_v22  ;;  %2215 = vst.msk [vmem:[%s3818_s24] sm:$0xff] %vm2214_vm1, %v2182_v44  ;;  %v3078_v50 = vadd.f32 %v3015_v48, %v3783_v0  ;;  %v1924_v51 = vpop.f32.mrb[11].mxu0 }
 0x156   : > { %v2185_v52 = vmul.f32 %v3811_v32, %v2149_v46  ;;  %3226 = vtanh.f32 %v2080_v47  ;;  %v3079_v53 = vadd.f32 %v1924_v51, %v3785_v1 }
 0x157   : > { %v3217_v54 = vpop.eup %3216  ;;  %v2184_v55 = vmul.f32 %v3811_v32, %v2148_v49  ;;  %v2083_v56 = vadd.f32 %v3078_v50, %v3798_v7 }
 0x158   : > { %v3219_v57 = vpop.eup %3218  ;;  %v2151_v58 = vsub.f32 %v3217_v54, %v3806_v22  ;;  %2218 = vst.msk [vmem:[%s3818_s24 + $0x18] sm:$0xff] %vm2214_vm1, %v2185_v52  ;;  %v2082_v59 = vadd.f32 %v3079_v53, %v3798_v7  ;;  %v3018_v60 = vpop.f32.mrb[12].mxu0 }
 0x159   : > { %v2150_v61 = vsub.f32 %v3219_v57, %v3806_v22  ;;  %2217 = vst.msk [vmem:[%s3818_s24 + $0x10] sm:$0xff] %vm2214_vm1, %v2184_v55  ;;  %3228 = vtanh.f32 %v2083_v56  ;;  %v3080_v62 = vadd.f32 %v3018_v60, %v3787_v2  ;;  %v1934_v63 = vpop.f32.mrb[13].mxu0 }
 0x15a   : > { %v2187_v0 = vmul.f32 %v3811_v32, %v2151_v58  ;;  %3230 = vtanh.f32 %v2082_v59  ;;  %v3081_v1 = vadd.f32 %v1934_v63, %v3789_v3 }
 0x15b   : > { %v3221_v6 = vpop.eup %3220  ;;  %v2186_v8 = vmul.f32 %v3811_v32, %v2150_v61  ;;  %v2085_v9 = vadd.f32 %v3080_v62, %v3798_v7 }
 0x15c   : > { %v3223_v10 = vpop.eup %3222  ;;  %v2153_v11 = vsub.f32 %v3221_v6, %v3806_v22  ;;  %2220 = vst.msk [vmem:[%s3818_s24 + $0x28] sm:$0xff] %vm2214_vm1, %v2187_v0  ;;  %v2084_v12 = vadd.f32 %v3081_v1, %v3798_v7  ;;  %v3021_v2 = vpop.f32.mrb[14].mxu0 }
 0x15d   : > { %v2152_v13 = vsub.f32 %v3223_v10, %v3806_v22  ;;  %2219 = vst.msk [vmem:[%s3818_s24 + $0x20] sm:$0xff] %vm2214_vm1, %v2186_v8  ;;  %3232 = vtanh.f32 %v2085_v9  ;;  %v3082_v3 = vadd.f32 %v3021_v2, %v3791_v4  ;;  %v1944_v14 = vpop.f32.mrb[15].mxu0 }
 0x15e   : > { %v2189_v15 = vmul.f32 %v3811_v32, %v2153_v11  ;;  %3234 = vtanh.f32 %v2084_v12  ;;  %v3083_v16 = vadd.f32 %v1944_v14, %v3793_v5 }
 0x15f   : > { %v3225_v17 = vpop.eup %3224  ;;  %v2188_v18 = vmul.f32 %v3811_v32, %v2152_v13  ;;  %v2087_v19 = vadd.f32 %v3082_v3, %v3798_v7 }
 0x160   : > { %v2920_v20 = vpop.f32.mrb[16].mxu1  ;;  %v3227_v21 = vpop.eup %3226  ;;  %v2155_v23 = vsub.f32 %v3225_v17, %v3806_v22  ;;  %2222 = vst.msk [vmem:[%s3818_s24 + $0x38] sm:$0xff] %vm2214_vm1, %v2189_v15  ;;  %v2086_v24 = vadd.f32 %v3083_v16, %v3798_v7 }
 0x161   : > { %v3024_v4 = vpop.f32.mrb[16].mxu0  ;;  %v1174_v25 = vpop.f32.mrb[17].mxu1  ;;  %2221 = vst.msk [vmem:[%s3818_s24 + $0x30] sm:$0xff] %vm2214_vm1, %v2188_v18  ;;  %v2154_v5 = vsub.f32 %v3227_v21, %v3806_v22  ;;  %3236 = vtanh.f32 %v2087_v19 }
 0x162   : > { %v3084_v26 = vadd.f32 %v3024_v4, %v2920_v20  ;;  %v1954_v27 = vpop.f32.mrb[17].mxu0  ;;  %v2191_v28 = vmul.f32 %v3811_v32, %v2155_v23  ;;  %3238 = vtanh.f32 %v2086_v24 }
 0x163   : > { %v3085_v29 = vadd.f32 %v1954_v27, %v1174_v25  ;;  %v3229_v30 = vpop.eup %3228  ;;  %v2190_v31 = vmul.f32 %v3811_v32, %v2154_v5 }
 0x164   : > { %v2089_v33 = vadd.f32 %v3084_v26, %v3798_v7  ;;  %v2923_v34 = vpop.f32.mrb[18].mxu1  ;;  %v3231_v35 = vpop.eup %3230  ;;  %2224 = vst.msk [vmem:[%s3818_s24 + $0x48] sm:$0xff] %vm2214_vm1, %v2191_v28  ;;  %v2157_v36 = vsub.f32 %v3229_v30, %v3806_v22 }
 0x165   : > { %v2088_v37 = vadd.f32 %v3085_v29, %v3798_v7  ;;  %v3027_v38 = vpop.f32.mrb[18].mxu0  ;;  %v1184_v39 = vpop.f32.mrb[19].mxu1  ;;  %2223 = vst.msk [vmem:[%s3818_s24 + $0x40] sm:$0xff] %vm2214_vm1, %v2190_v31  ;;  %v2156_v40 = vsub.f32 %v3231_v35, %v3806_v22 }
 0x166   : > { %3240 = vtanh.f32 %v2089_v33  ;;  %v3086_v41 = vadd.f32 %v3027_v38, %v2923_v34  ;;  %v1964_v42 = vpop.f32.mrb[19].mxu0  ;;  %v2193_v43 = vmul.f32 %v3811_v32, %v2157_v36 }
 0x167   : > { %3242 = vtanh.f32 %v2088_v37  ;;  %v3087_v44 = vadd.f32 %v1964_v42, %v1184_v39  ;;  %v3233_v45 = vpop.eup %3232  ;;  %v2192_v46 = vmul.f32 %v3811_v32, %v2156_v40 }
 0x168   : > { %v2091_v47 = vadd.f32 %v3086_v41, %v3798_v7  ;;  %v2926_v48 = vpop.f32.mrb[20].mxu1  ;;  %v3235_v49 = vpop.eup %3234  ;;  %2226 = vst.msk [vmem:[%s3818_s24 + $0x58] sm:$0xff] %vm2214_vm1, %v2193_v43  ;;  %v2159_v50 = vsub.f32 %v3233_v45, %v3806_v22 }
 0x169   : > { %v2090_v51 = vadd.f32 %v3087_v44, %v3798_v7  ;;  %v3030_v52 = vpop.f32.mrb[20].mxu0  ;;  %v1194_v53 = vpop.f32.mrb[21].mxu1  ;;  %2225 = vst.msk [vmem:[%s3818_s24 + $0x50] sm:$0xff] %vm2214_vm1, %v2192_v46  ;;  %v2158_v54 = vsub.f32 %v3235_v49, %v3806_v22 }
 0x16a   : > { %3244 = vtanh.f32 %v2091_v47  ;;  %v3088_v55 = vadd.f32 %v3030_v52, %v2926_v48  ;;  %v1974_v56 = vpop.f32.mrb[21].mxu0  ;;  %v2195_v57 = vmul.f32 %v3811_v32, %v2159_v50 }
 0x16b   : > { %3246 = vtanh.f32 %v2090_v51  ;;  %v3089_v58 = vadd.f32 %v1974_v56, %v1194_v53  ;;  %v3237_v59 = vpop.eup %3236  ;;  %v2194_v60 = vmul.f32 %v3811_v32, %v2158_v54 }
 0x16c   : > { %v2093_v61 = vadd.f32 %v3088_v55, %v3798_v7  ;;  %v2929_v62 = vpop.f32.mrb[22].mxu1  ;;  %v3239_v63 = vpop.eup %3238  ;;  %2228 = vst.msk [vmem:[%s3818_s24 + $0x68] sm:$0xff] %vm2214_vm1, %v2195_v57  ;;  %v2161_v0 = vsub.f32 %v3237_v59, %v3806_v22 }
 0x16d   : > { %v2092_v1 = vadd.f32 %v3089_v58, %v3798_v7  ;;  %v3033_v6 = vpop.f32.mrb[22].mxu0  ;;  %v1204_v8 = vpop.f32.mrb[23].mxu1  ;;  %2227 = vst.msk [vmem:[%s3818_s24 + $0x60] sm:$0xff] %vm2214_vm1, %v2194_v60  ;;  %v2160_v9 = vsub.f32 %v3239_v63, %v3806_v22 }
 0x16e   : > { %3248 = vtanh.f32 %v2093_v61  ;;  %v3090_v10 = vadd.f32 %v3033_v6, %v2929_v62  ;;  %v1984_v11 = vpop.f32.mrb[23].mxu0  ;;  %v2197_v12 = vmul.f32 %v3811_v32, %v2161_v0 }
 0x16f   : > { %3250 = vtanh.f32 %v2092_v1  ;;  %v3091_v2 = vadd.f32 %v1984_v11, %v1204_v8  ;;  %v2196_v3 = vmul.f32 %v3811_v32, %v2160_v9 }
 0x170   : > { %v3241_v13 = vpop.eup %3240  ;;  %v2095_v14 = vadd.f32 %v3090_v10, %v3798_v7  ;;  %v2932_v15 = vpop.f32.mrb[24].mxu1  ;;  %2230 = vst.msk [vmem:[%s3818_s24 + $0x78] sm:$0xff] %vm2214_vm1, %v2197_v12 }
 0x171   : > { %v3243_v16 = vpop.eup %3242  ;;  %v2163_v17 = vsub.f32 %v3241_v13, %v3806_v22  ;;  %v2094_v18 = vadd.f32 %v3091_v2, %v3798_v7  ;;  %v3036_v19 = vpop.f32.mrb[24].mxu0  ;;  %2229 = vst.msk [vmem:[%s3818_s24 + $0x70] sm:$0xff] %vm2214_vm1, %v2196_v3 }
 0x172   : > { %v1214_v20 = vpop.f32.mrb[25].mxu1  ;;  %v2162_v21 = vsub.f32 %v3243_v16, %v3806_v22  ;;  %3252 = vtanh.f32 %v2095_v14  ;;  %v3092_v23 = vadd.f32 %v3036_v19, %v2932_v15  ;;  %v1994_v24 = vpop.f32.mrb[25].mxu0 }
 0x173   : > { %v2199_v4 = vmul.f32 %v3811_v32, %v2163_v17  ;;  %3254 = vtanh.f32 %v2094_v18  ;;  %v3093_v25 = vadd.f32 %v1994_v24, %v1214_v20 }
 0x174   : > { %v3245_v5 = vpop.eup %3244  ;;  %v2198_v26 = vmul.f32 %v3811_v32, %v2162_v21  ;;  %v2097_v27 = vadd.f32 %v3092_v23, %v3798_v7  ;;  %v2935_v28 = vpop.f32.mrb[26].mxu1 }
 0x175   : > { %v3247_v29 = vpop.eup %3246  ;;  %2232 = vst.msk [vmem:[%s3818_s24 + $0x88] sm:$0xff] %vm2214_vm1, %v2199_v4  ;;  %v2165_v30 = vsub.f32 %v3245_v5, %v3806_v22  ;;  %v2096_v31 = vadd.f32 %v3093_v25, %v3798_v7  ;;  %v3039_v33 = vpop.f32.mrb[26].mxu0 }
 0x176   : > { %v1224_v34 = vpop.f32.mrb[27].mxu1  ;;  %2231 = vst.msk [vmem:[%s3818_s24 + $0x80] sm:$0xff] %vm2214_vm1, %v2198_v26  ;;  %v2164_v35 = vsub.f32 %v3247_v29, %v3806_v22  ;;  %3256 = vtanh.f32 %v2097_v27  ;;  %v3094_v36 = vadd.f32 %v3039_v33, %v2935_v28  ;;  %v2004_v37 = vpop.f32.mrb[27].mxu0 }
 0x177   : > { %v2201_v38 = vmul.f32 %v3811_v32, %v2165_v30  ;;  %3258 = vtanh.f32 %v2096_v31  ;;  %v3095_v39 = vadd.f32 %v2004_v37, %v1224_v34 }
 0x178   : > { %v3249_v40 = vpop.eup %3248  ;;  %v2200_v41 = vmul.f32 %v3811_v32, %v2164_v35  ;;  %v2099_v42 = vadd.f32 %v3094_v36, %v3798_v7  ;;  %v2938_v43 = vpop.f32.mrb[28].mxu1 }
 0x179   : > { %v3251_v44 = vpop.eup %3250  ;;  %2234 = vst.msk [vmem:[%s3818_s24 + $0x98] sm:$0xff] %vm2214_vm1, %v2201_v38  ;;  %v2167_v45 = vsub.f32 %v3249_v40, %v3806_v22  ;;  %v2098_v46 = vadd.f32 %v3095_v39, %v3798_v7  ;;  %v3042_v47 = vpop.f32.mrb[28].mxu0 }
 0x17a   : > { %v1234_v48 = vpop.f32.mrb[29].mxu1  ;;  %2233 = vst.msk [vmem:[%s3818_s24 + $0x90] sm:$0xff] %vm2214_vm1, %v2200_v41  ;;  %v2166_v49 = vsub.f32 %v3251_v44, %v3806_v22  ;;  %3260 = vtanh.f32 %v2099_v42  ;;  %v3096_v50 = vadd.f32 %v3042_v47, %v2938_v43  ;;  %v2014_v51 = vpop.f32.mrb[29].mxu0 }
 0x17b   : > { %v2203_v52 = vmul.f32 %v3811_v32, %v2167_v45  ;;  %3262 = vtanh.f32 %v2098_v46  ;;  %v3097_v53 = vadd.f32 %v2014_v51, %v1234_v48 }
 0x17c   : > { %v3253_v54 = vpop.eup %3252  ;;  %v2202_v55 = vmul.f32 %v3811_v32, %v2166_v49  ;;  %v2101_v56 = vadd.f32 %v3096_v50, %v3798_v7  ;;  %v2941_v57 = vpop.f32.mrb[30].mxu1 }
 0x17d   : > { %v3255_v58 = vpop.eup %3254  ;;  %2236 = vst.msk [vmem:[%s3818_s24 + $0xa8] sm:$0xff] %vm2214_vm1, %v2203_v52  ;;  %v2169_v59 = vsub.f32 %v3253_v54, %v3806_v22  ;;  %v2100_v60 = vadd.f32 %v3097_v53, %v3798_v7  ;;  %v3045_v61 = vpop.f32.mrb[30].mxu0 }
 0x17e   : > { %v1244_v62 = vpop.f32.mrb[31].mxu1  ;;  %2235 = vst.msk [vmem:[%s3818_s24 + $0xa0] sm:$0xff] %vm2214_vm1, %v2202_v55  ;;  %v2168_v63 = vsub.f32 %v3255_v58, %v3806_v22  ;;  %3264 = vtanh.f32 %v2101_v56  ;;  %v3098_v0 = vadd.f32 %v3045_v61, %v2941_v57  ;;  %v2024_v1 = vpop.f32.mrb[31].mxu0 }
 0x17f   : > { %v2205_v6 = vmul.f32 %v3811_v32, %v2169_v59  ;;  %3266 = vtanh.f32 %v2100_v60  ;;  %v3099_v8 = vadd.f32 %v2024_v1, %v1244_v62 }
 0x180   : > { %v3257_v9 = vpop.eup %3256  ;;  %v2204_v10 = vmul.f32 %v3811_v32, %v2168_v63  ;;  %v2103_v11 = vadd.f32 %v3098_v0, %v3798_v7 }
 0x181   : > { %v3259_v12 = vpop.eup %3258  ;;  %2238 = vst.msk [vmem:[%s3818_s24 + $0xb8] sm:$0xff] %vm2214_vm1, %v2205_v6  ;;  %v2171_v2 = vsub.f32 %v3257_v9, %v3806_v22  ;;  %v2102_v13 = vadd.f32 %v3099_v8, %v3798_v7 }
 0x182   : > { %2237 = vst.msk [vmem:[%s3818_s24 + $0xb0] sm:$0xff] %vm2214_vm1, %v2204_v10  ;;  %v2170_v3 = vsub.f32 %v3259_v12, %v3806_v22  ;;  %3268 = vtanh.f32 %v2103_v11 }
 0x183   : > { %v2207_v14 = vmul.f32 %v3811_v32, %v2171_v2  ;;  %3270 = vtanh.f32 %v2102_v13 }
 0x184   : > { %v3261_v15 = vpop.eup %3260  ;;  %v2206_v16 = vmul.f32 %v3811_v32, %v2170_v3 }
 0x185   : > { %v3263_v17 = vpop.eup %3262  ;;  %2240 = vst.msk [vmem:[%s3818_s24 + $0xc8] sm:$0xff] %vm2214_vm1, %v2207_v14  ;;  %v2173_v18 = vsub.f32 %v3261_v15, %v3806_v22 }
 0x186   : > { %2239 = vst.msk [vmem:[%s3818_s24 + $0xc0] sm:$0xff] %vm2214_vm1, %v2206_v16  ;;  %v2172_v7 = vsub.f32 %v3263_v17, %v3806_v22 }
 0x187   : > { %v2209_v19 = vmul.f32 %v3811_v32, %v2173_v18 }
 0x188   : > { %v3265_v20 = vpop.eup %3264  ;;  %v2208_v21 = vmul.f32 %v3811_v32, %v2172_v7 }
 0x189   : > { %v3267_v23 = vpop.eup %3266  ;;  %2242 = vst.msk [vmem:[%s3818_s24 + $0xd8] sm:$0xff] %vm2214_vm1, %v2209_v19  ;;  %v2175_v24 = vsub.f32 %v3265_v20, %v3806_v22 }
 0x18a   : > { %2241 = vst.msk [vmem:[%s3818_s24 + $0xd0] sm:$0xff] %vm2214_vm1, %v2208_v21  ;;  %v2174_v4 = vsub.f32 %v3267_v23, %v3806_v22 }
 0x18b   : > { %v2211_v25 = vmul.f32 %v3811_v32, %v2175_v24 }
 0x18c   : > { %v3269_v5 = vpop.eup %3268  ;;  %v2210_v26 = vmul.f32 %v3811_v32, %v2174_v4 }
 0x18d   : > { %v3271_v27 = vpop.eup %3270  ;;  %2244 = vst.msk [vmem:[%s3818_s24 + $0xe8] sm:$0xff] %vm2214_vm1, %v2211_v25  ;;  %v2177_v28 = vsub.f32 %v3269_v5, %v3806_v22 }
 0x18e   : > { %2243 = vst.msk [vmem:[%s3818_s24 + $0xe0] sm:$0xff] %vm2214_vm1, %v2210_v26  ;;  %v2176_v29 = vsub.f32 %v3271_v27, %v3806_v22 }
 0x18f   : > { %v2213_v30 = vmul.f32 %v3811_v32, %v2177_v28 }
 0x190   : > { %v2212_v31 = vmul.f32 %v3811_v32, %v2176_v29 }
 0x191   : > { %2246 = vst.msk [vmem:[%s3818_s24 + $0xf8] sm:$0xff] %vm2214_vm1, %v2213_v30 }
 0x192   : > { %2245 = vst.msk [vmem:[%s3818_s24 + $0xf0] sm:$0xff] %vm2214_vm1, %v2212_v31 }
 0x193 PF: > { %s14_s15 = sadd.s32 1, %s3278_s15  }
 0x194   : > { %p11_p4 = scmp.ge.s32.totalorder %s14_s15, 5  }
 0x196   :  { %13 = sbr.rel (!%p11_p4) target bundleno = 1 (0x1), region = 72 }

</bundles_post_ra>
